<compile_context>
chip_gen: v5e
topology: v5e:2x2
jax: 0.10.0
libtpu: 0.0.40
codegen_flags: <defaults>
</compile_context>

<pallas_src>
import functools

import jax
import jax.numpy as jnp
from jax.experimental import pallas as pl
from jax.experimental.pallas import tpu as pltpu


def _round_up(n, m):
    return ((n + m - 1) // m) * m


def qnetwork_kernel(x_ref, w1_ref, b1_ref, w2_ref, b2_ref, w3_ref, b3_ref, out_ref):
    """One batch tile of the fused 3-layer MLP.

    x_ref : (TB, state_size)  f32
    w1_ref: (state_size, fc1) f32    b1_ref: (1, fc1) f32
    w2_ref: (fc1, fc2)        bf16   b2_ref: (1, fc2) f32
    w3_ref: (fc2, act)        bf16   b3_ref: (1, act) f32
    out_ref: (TB, act)        f32
    """
    # fc1 + ReLU — f32 matmul (K = state_size is tiny); keeps input precision.
    h1 = jnp.dot(x_ref[...], w1_ref[...], preferred_element_type=jnp.float32)
    h1 = jnp.maximum(h1 + b1_ref[...], 0.0).astype(jnp.bfloat16)

    # fc2 + ReLU — bf16 MXU operands, f32 accumulation / elementwise.
    h2 = jnp.dot(h1, w2_ref[...], preferred_element_type=jnp.float32)
    h2 = jnp.maximum(h2 + b2_ref[...], 0.0).astype(jnp.bfloat16)

    # out (no activation) — unpadded store (block last dim == full array dim).
    out_ref[...] = (
        jnp.dot(h2, w3_ref[...], preferred_element_type=jnp.float32) + b3_ref[...]
    )


@functools.partial(jax.jit, static_argnames=("tb",))
def _forward_impl(x, w1, b1, w2_bf, b2, w3_bf, b3, *, tb):
    batch, state_size = x.shape
    action_size = w3_bf.shape[1]

    # Pad batch rows so the tile divides exactly (no-op for the common RL batch
    # sizes 8/16/.../1024 etc.; tiny copy otherwise).
    b_pad = _round_up(_round_up(batch, 8), tb)
    if b_pad != batch:
        x = jnp.pad(x, ((0, b_pad - batch), (0, 0)))

    grid = (b_pad // tb,)

    # Weights / biases: constant index_map -> resident in VMEM across all tiles.
    resident = lambda a: pl.BlockSpec(a.shape, lambda i: (0, 0))

    out = pl.pallas_call(
        qnetwork_kernel,
        out_shape=jax.ShapeDtypeStruct((b_pad, action_size), jnp.float32),
        grid=grid,
        in_specs=[
            pl.BlockSpec((tb, state_size), lambda i: (i, 0)),  # x streamed over batch
            resident(w1),
            resident(b1),
            resident(w2_bf),
            resident(b2),
            resident(w3_bf),
            resident(b3),
        ],
        out_specs=pl.BlockSpec((tb, action_size), lambda i: (i, 0)),
        compiler_params=pltpu.CompilerParams(
            dimension_semantics=("parallel",),  # batch tiles independent (megacore on v7x)
        ),
    )(x, w1, b1, w2_bf, b2, w3_bf, b3)

    if b_pad != batch:
        out = out[:batch]
    return out


def qnetwork_forward(x, kparams, *, tb_max=2048):
    """Fused forward pass.

    x: (B, state_size) float32
    kparams: output of prepare_params() (w2/w3 pre-cast to bf16, rest f32).
    Returns (B, action_size) float32.
    """
    batch = x.shape[0]
    b8 = _round_up(batch, 8)
    # >= 2 tiles when the batch is big enough so the batch axis can split
    # across the two TensorCores on v7x; cap the tile at tb_max.
    n_tiles = max(2 if b8 >= 16 else 1, pl.cdiv(b8, tb_max))
    tb = _round_up(pl.cdiv(b8, n_tiles), 8)
    return _forward_impl(
        x,
        kparams["w1"], kparams["b1"],
        kparams["w2"], kparams["b2"],
        kparams["w3"], kparams["b3"],
        tb=tb,
    )


def init_params(key, state_size, action_size, fc1_size=64, fc2_size=64):
    """Deterministic init mimicking nn.Linear's U(-1/sqrt(fan_in), 1/sqrt(fan_in))."""
    ks = jax.random.split(key, 6)

    def linear(kw, kb, fan_in, fan_out):
        bound = 1.0 / jnp.sqrt(fan_in)
        w = jax.random.uniform(kw, (fan_in, fan_out), jnp.float32, -bound, bound)
        b = jax.random.uniform(kb, (1, fan_out), jnp.float32, -bound, bound)
        return w, b

    w1, b1 = linear(ks[0], ks[1], state_size, fc1_size)
    w2, b2 = linear(ks[2], ks[3], fc1_size, fc2_size)
    w3, b3 = linear(ks[4], ks[5], fc2_size, action_size)
    return {"w1": w1, "b1": b1, "w2": w2, "b2": b2, "w3": w3, "b3": b3}


def prepare_params(params):
    """One-time conversion to kernel-ready layout (bf16 hidden-layer weights).

    Do this ONCE (e.g. after each optimizer step), not per forward call.
    """
    return {
        "w1": params["w1"],                       # f32 (first matmul stays f32)
        "b1": params["b1"],
        "w2": params["w2"].astype(jnp.bfloat16),
        "b2": params["b2"],
        "w3": params["w3"].astype(jnp.bfloat16),
        "b3": params["b3"],
    }


def reference_forward(x, p):
    h1 = jnp.maximum(x @ p["w1"] + p["b1"], 0.0)
    h2 = jnp.maximum(h1 @ p["w2"] + p["b2"], 0.0)
    return h2 @ p["w3"] + p["b3"]


if __name__ == "__main__":
    key = jax.random.PRNGKey(0)
    k_params, k_x = jax.random.split(key)

    batch = 2
    state_size = 8
    action_size = 4

    params = init_params(k_params, state_size, action_size, fc1_size=64, fc2_size=64)
    kparams = prepare_params(params)  # one-time bf16 cast, outside the hot path
    x = jax.random.normal(k_x, (batch, state_size), jnp.float32)

    out = qnetwork_forward(x, kparams)
    out = jax.block_until_ready(out)

    ref = reference_forward(x, params)
    assert out.shape == (batch, action_size), out.shape
    # bf16 hidden-layer weights/activations vs f32 reference -> looser tolerance.
    assert jnp.allclose(out, ref, atol=2e-2, rtol=2e-2), (
        "mismatch vs reference: " + str(jnp.max(jnp.abs(out - ref)))
    )

    print("KERNEL_OK")
</pallas_src>

<mosaic_0001>
module attributes {stable_mosaic.version = 11 : i64} {
  func.func @qnetwork_kernel(%arg0: i32, %arg1: memref<8x8xf32, #tpu.memory_space<vmem>>, %arg2: memref<8x64xf32, #tpu.memory_space<vmem>>, %arg3: memref<1x64xf32, #tpu.memory_space<vmem>>, %arg4: memref<64x64xbf16, #tpu.memory_space<vmem>>, %arg5: memref<1x64xf32, #tpu.memory_space<vmem>>, %arg6: memref<64x4xbf16, #tpu.memory_space<vmem>>, %arg7: memref<1x4xf32, #tpu.memory_space<vmem>>, %arg8: memref<8x4xf32, #tpu.memory_space<vmem>>) attributes {dimension_semantics = [#tpu.dimension_semantics<parallel>], iteration_bounds = array<i64: 1>, scalar_prefetch = 0 : i64, scratch_operands = 0 : i64, tpu.core_type = #tpu.core_type<tc>, window_params = [{transform_indices = @transform_0, window_bounds = array<i64: 8, 8>}, {pipeline_mode = #tpu.pipeline_mode<synchronous>, transform_indices = @transform_1, window_bounds = array<i64: 8, 64>}, {pipeline_mode = #tpu.pipeline_mode<synchronous>, transform_indices = @transform_2, window_bounds = array<i64: 1, 64>}, {pipeline_mode = #tpu.pipeline_mode<synchronous>, transform_indices = @transform_3, window_bounds = array<i64: 64, 64>}, {pipeline_mode = #tpu.pipeline_mode<synchronous>, transform_indices = @transform_4, window_bounds = array<i64: 1, 64>}, {pipeline_mode = #tpu.pipeline_mode<synchronous>, transform_indices = @transform_5, window_bounds = array<i64: 64, 4>}, {pipeline_mode = #tpu.pipeline_mode<synchronous>, transform_indices = @transform_6, window_bounds = array<i64: 1, 4>}, {transform_indices = @transform_7, window_bounds = array<i64: 8, 4>}]} {
    %c0 = arith.constant 0 : index
    %c0_0 = arith.constant 0 : index
    %0 = vector.load %arg1[%c0, %c0_0] : memref<8x8xf32, #tpu.memory_space<vmem>>, vector<8x8xf32>
    %c0_1 = arith.constant 0 : index
    %c0_2 = arith.constant 0 : index
    %1 = vector.load %arg2[%c0_1, %c0_2] : memref<8x64xf32, #tpu.memory_space<vmem>>, vector<8x64xf32>
    %cst = arith.constant dense<0.000000e+00> : vector<8x64xf32>
    %2 = tpu.matmul %0, %1, %cst {dimension_numbers = #tpu.dot_dimension_numbers<[1], [0], [0], [1], [0, 0, 1, 1], [], []>} : vector<8x8xf32>, vector<8x64xf32>, vector<8x64xf32> -> vector<8x64xf32>
    %c0_3 = arith.constant 0 : index
    %c0_4 = arith.constant 0 : index
    %3 = vector.load %arg3[%c0_3, %c0_4] : memref<1x64xf32, #tpu.memory_space<vmem>>, vector<1x64xf32>
    %4 = vector.broadcast %3 : vector<1x64xf32> to vector<8x64xf32>
    %5 = arith.addf %2, %4 : vector<8x64xf32>
    %cst_5 = arith.constant 0.000000e+00 : f32
    %6 = vector.broadcast %cst_5 : f32 to vector<8x64xf32>
    %7 = arith.maximumf %5, %6 : vector<8x64xf32>
    %8 = arith.truncf %7 : vector<8x64xf32> to vector<8x64xbf16>
    %c0_6 = arith.constant 0 : index
    %c0_7 = arith.constant 0 : index
    %9 = vector.load %arg4[%c0_6, %c0_7] : memref<64x64xbf16, #tpu.memory_space<vmem>>, vector<64x64xbf16>
    %cst_8 = arith.constant dense<0.000000e+00> : vector<8x64xf32>
    %10 = tpu.matmul %8, %9, %cst_8 {dimension_numbers = #tpu.dot_dimension_numbers<[1], [0], [0], [1], [0, 0, 1, 1], [], []>} : vector<8x64xbf16>, vector<64x64xbf16>, vector<8x64xf32> -> vector<8x64xf32>
    %c0_9 = arith.constant 0 : index
    %c0_10 = arith.constant 0 : index
    %11 = vector.load %arg5[%c0_9, %c0_10] : memref<1x64xf32, #tpu.memory_space<vmem>>, vector<1x64xf32>
    %12 = vector.broadcast %11 : vector<1x64xf32> to vector<8x64xf32>
    %13 = arith.addf %10, %12 : vector<8x64xf32>
    %cst_11 = arith.constant 0.000000e+00 : f32
    %14 = vector.broadcast %cst_11 : f32 to vector<8x64xf32>
    %15 = arith.maximumf %13, %14 : vector<8x64xf32>
    %16 = arith.truncf %15 : vector<8x64xf32> to vector<8x64xbf16>
    %c0_12 = arith.constant 0 : index
    %c0_13 = arith.constant 0 : index
    %17 = vector.load %arg6[%c0_12, %c0_13] : memref<64x4xbf16, #tpu.memory_space<vmem>>, vector<64x4xbf16>
    %cst_14 = arith.constant dense<0.000000e+00> : vector<8x4xf32>
    %18 = tpu.matmul %16, %17, %cst_14 {dimension_numbers = #tpu.dot_dimension_numbers<[1], [0], [0], [1], [0, 0, 1, 1], [], []>} : vector<8x64xbf16>, vector<64x4xbf16>, vector<8x4xf32> -> vector<8x4xf32>
    %c0_15 = arith.constant 0 : index
    %c0_16 = arith.constant 0 : index
    %19 = vector.load %arg7[%c0_15, %c0_16] : memref<1x4xf32, #tpu.memory_space<vmem>>, vector<1x4xf32>
    %20 = vector.broadcast %19 : vector<1x4xf32> to vector<8x4xf32>
    %21 = arith.addf %18, %20 : vector<8x4xf32>
    %c0_17 = arith.constant 0 : index
    %c0_18 = arith.constant 0 : index
    %22 = vector.load %arg8[%c0_17, %c0_18] : memref<8x4xf32, #tpu.memory_space<vmem>>, vector<8x4xf32>
    tpu.vector_store %arg8[%c0_17, %c0_18], %21 {strides = array<i32>} : memref<8x4xf32, #tpu.memory_space<vmem>>, vector<8x4xf32>,
    return
  }
  func.func @transform_0(%arg0: i32) -> (i32, i32) {
    %c0_i32 = arith.constant 0 : i32
    %c0_i32_0 = arith.constant 0 : i32
    return %arg0, %c0_i32 : i32, i32
  }
  func.func @transform_1(%arg0: i32) -> (i32, i32) {
    %c0_i32 = arith.constant 0 : i32
    %c0_i32_0 = arith.constant 0 : i32
    %c0_i32_1 = arith.constant 0 : i32
    return %c0_i32, %c0_i32_0 : i32, i32
  }
  func.func @transform_2(%arg0: i32) -> (i32, i32) {
    %c0_i32 = arith.constant 0 : i32
    %c0_i32_0 = arith.constant 0 : i32
    %c0_i32_1 = arith.constant 0 : i32
    return %c0_i32, %c0_i32_0 : i32, i32
  }
  func.func @transform_3(%arg0: i32) -> (i32, i32) {
    %c0_i32 = arith.constant 0 : i32
    %c0_i32_0 = arith.constant 0 : i32
    %c0_i32_1 = arith.constant 0 : i32
    return %c0_i32, %c0_i32_0 : i32, i32
  }
  func.func @transform_4(%arg0: i32) -> (i32, i32) {
    %c0_i32 = arith.constant 0 : i32
    %c0_i32_0 = arith.constant 0 : i32
    %c0_i32_1 = arith.constant 0 : i32
    return %c0_i32, %c0_i32_0 : i32, i32
  }
  func.func @transform_5(%arg0: i32) -> (i32, i32) {
    %c0_i32 = arith.constant 0 : i32
    %c0_i32_0 = arith.constant 0 : i32
    %c0_i32_1 = arith.constant 0 : i32
    return %c0_i32, %c0_i32_0 : i32, i32
  }
  func.func @transform_6(%arg0: i32) -> (i32, i32) {
    %c0_i32 = arith.constant 0 : i32
    %c0_i32_0 = arith.constant 0 : i32
    %c0_i32_1 = arith.constant 0 : i32
    return %c0_i32, %c0_i32_0 : i32, i32
  }
  func.func @transform_7(%arg0: i32) -> (i32, i32) {
    %c0_i32 = arith.constant 0 : i32
    %c0_i32_0 = arith.constant 0 : i32
    return %arg0, %c0_i32 : i32, i32
  }
}

</mosaic_0001>

<bundles_post_ra>
// kernel: _forward_impl.1
= control target key start
LH: loop header
LB: loop body
LE: loop exit
PB: predicated region body
PF: predicated region fallthrough
CT: control target
= control target key end

     0   :  { %vm33_vm0 = vcmask 64512   ;;  %vm95_vm1 = vcmask 523264   ;;  %vm166_vm2 = vcmask 31744   ;;  %s300_s1 = inlined_call_operand.vmem [shape: f32[8,64], index: 1, kind: input, shape index: {}]   ;;  %s301_s0 = inlined_call_operand.vmem [shape: f32[8,8], index: 0, kind: input, shape index: {}]   ;;  %s302_s3 = inlined_call_operand.vmem [shape: bf16[64,64], index: 3, kind: input, shape index: {}]   ;;  %s303_s2 = inlined_call_operand.vmem [shape: f32[1,64], index: 2, kind: input, shape index: {}]   ;;  %s304_s4 = inlined_call_operand.vmem [shape: f32[1,64], index: 4, kind: input, shape index: {}]   ;;  %s305_s5 = inlined_call_operand.vmem [shape: bf16[64,4], index: 5, kind: input, shape index: {}]   ;;  %s306_s6 = inlined_call_operand.vmem [shape: f32[1,4], index: 6, kind: input, shape index: {}]   ;;  %s307_s7 = inlined_call_operand.vmem [shape: f32[8,4], index: 7, kind: output, shape index: {}]  }
   0x1   :  { %v28_v0 = vld [vmem:[%s300_s1] sm:$0xff]  ;;  %v210_v2 = vld [vmem:[%s302_s3 + $0x18] sm:$0xff]  ;;  %v209_v3 = vld [vmem:[%s302_s3 + $0x10] sm:$0xff] }
   0x2   :  { %v27_v1 = vld [vmem:[%s301_s0] sm:$0xff]  ;;  %52 = vmatpush.msra.mxu0 %v28_v0  ;;  %103 = vmatpush.bf16.msra.mxu1 %v210_v2  ;;  %v208_v4 = vld [vmem:[%s302_s3 + $0x8] sm:$0xff]  ;;  %v214_v6 = vld [vmem:[%s305_s5 + $0x18] sm:$0xff] }
   0x3   :  { %172 = vmatmul.msk.f32.vlgmr.msra.gmra.mxu0 %vm33_vm0, %v27_v1  ;;  %v207_v5 = vld [vmem:[%s302_s3] sm:$0xff]  ;;  %157 = vmatpush.bf16.msra.mxu2 %v214_v6  ;;  %v213_v7 = vld [vmem:[%s305_s5 + $0x10] sm:$0xff]  ;;  %v212_v13 = vld [vmem:[%s305_s5 + $0x8] sm:$0xff] }
   0x4   :  { %v215_v8 = vld [vmem:[%s303_s2] ss:$0 sm:$0xff] }
   0x5   :  { %v211_v14 = vld [vmem:[%s305_s5] sm:$0xff] }
   0x6   :  { %104 = vmatpush.bf16.msra.mxu1 %v209_v3  ;;  %v216_v15 = vld [vmem:[%s304_s4] ss:$0 sm:$0xff] }
   0x7   :  { %158 = vmatpush.bf16.msra.mxu2 %v213_v7  ;;  %v217_v21 = vld [vmem:[%s306_s6] ss:$0 sm:$0xff] }
   0xa   :  { %105 = vmatpush.bf16.msra.mxu1 %v208_v4 }
   0xb   :  { %159 = vmatpush.bf16.msra.mxu2 %v212_v13 }
   0xe   :  { %106 = vmatpush.bf16.msra.mxu1 %v207_v5 }
   0xf   :  { %160 = vmatpush.bf16.msra.mxu2 %v211_v14 }
  0x80   :  { %v54_v9 = vpop.f32.mrf.mxu0 }
  0x81   :  { %v55_v10 = vadd.f32 %v215_v8, %v54_v9 }
  0x83   :  { %v57_v11 = vmax.f32 %v55_v10, 0.0 }
  0x85   :  { %v58_v12 = vpack.c.bf16 %v57_v11, %v57_v11 }
  0x87   :  { %189 = vmatmul.msk.bf16.vlgmr.msra.gmra.mxu1 %vm95_vm1, %v58_v12 }
 0x104   :  { %v108_v16 = vpop.f32.mrf.mxu1 }
 0x105   :  { %v109_v17 = vadd.f32 %v216_v15, %v108_v16 }
 0x107   :  { %v112_v18 = vmax.f32 %v109_v17, 0.0 }
 0x109   :  { %v113_v19 = vpack.c.bf16 %v112_v18, %v112_v18 }
 0x10b   :  { %206 = vmatmul.msk.bf16.vlgmr.msra.gmra.mxu2 %vm95_vm1, %v113_v19 }
 0x10c   :  { %v110_v20 = vpop.f32.mrf.mxu1 }
 0x18e   :  { %v162_v22 = vpop.f32.mrf.mxu2 }
 0x18f   :  { %v163_v23 = vadd.f32 %v217_v21, %v162_v22 }
 0x191   :  { %167 = vst.msk [vmem:[%s307_s7] sm:$0xff] %vm166_vm2, %v163_v23 }
 0x196   :  { %v164_v24 = vpop.f32.mrf.mxu2 }

</bundles_post_ra>
